<compile_context>
chip_gen: v6e
topology: v6e:2x2x1
jax: 0.10.0
libtpu: 0.0.40
codegen_flags: <defaults>
</compile_context>

<pallas_src>
import functools

import jax
import jax.numpy as jnp
import numpy as np
from jax.experimental import pallas as pl
from jax.experimental.pallas import tpu as pltpu


# ----------------------------- sizing helpers -------------------------------
def _round_up(x, m):
    return ((x + m - 1) // m) * m


def _vmem_capacity_bytes():
    try:
        return int(pltpu.get_tpu_info().vmem_capacity_bytes)
    except Exception:
        return 64 * 1024 * 1024  # conservative: v7x has 64 MiB per TensorCore


def _pass2_vmem_bytes(tile_v, n, nh, f, out_pad):
    """Estimate of the attention kernel's live VMEM set (padded layouts)."""
    n_lane = _round_up(n, 128)
    adj = 2 * _round_up(tile_v, 32) * n_lane                    # int8 strip x2
    z = 2 * nh * _round_up(n, 8) * _round_up(f, 128) * 4        # resident z x2
    el = 2 * _round_up(nh, 8) * n_lane * 4                      # resident el x2
    er = 2 * _round_up(tile_v, 8) * 128 * 4                     # er strip x2
    out = 2 * _round_up(tile_v, 8) * _round_up(out_pad, 128) * 4
    tmp = 5 * tile_v * n_lane * 4                               # mask/e/p temps
    return adj + z + el + er + out + tmp + (2 << 20)


def _pick_tile_p(n):
    """Row tile for the projection pass (appears as a lane dim of el_t)."""
    for c in (1024, 512, 256, 128):
        if n % c == 0:
            return c
    return n


def _pick_tile_v(n, nh, f, out_pad, budget):
    """Dst-strip tile: largest ladder entry that divides N and fits VMEM,
    preferring a grid of >=2 strips so both v7x TensorCores get work."""
    fitting = [c for c in (1024, 512, 256, 128, 64, 32)
               if n % c == 0 and _pass2_vmem_bytes(c, n, nh, f, out_pad) <= budget]
    multi = [c for c in fitting if n // c >= 2]
    if multi:
        return multi[0]
    if fitting:
        return fitting[0]
    return n  # small / irregular graphs: single full-extent strip


# --------------------------- projection kernel ------------------------------
def _make_proj_kernel(num_heads):
    def kernel(h_ref, w_ref, al_ref, ar_ref, z_ref, el_ref, er_ref):
        hblk = h_ref[...]                                        # (TP, Din)
        for hd in range(num_heads):
            z_h = jnp.dot(hblk, w_ref[hd],
                          preferred_element_type=jnp.float32)    # (TP, F)
            z_ref[hd] = z_h
            # el[h, u] = <z[h, u], attn_l[h]>  -> lane-dense (1, TP) row
            el_ref[hd:hd + 1, :] = jax.lax.dot_general(
                al_ref[hd:hd + 1, :], z_h, (((1,), (1,)), ((), ())),
                preferred_element_type=jnp.float32)
            # er[u, h] = <z[h, u], attn_r[h]>  -> (TP, 1) column
            er_ref[:, hd:hd + 1] = jax.lax.dot_general(
                z_h, ar_ref[hd:hd + 1, :], (((1,), (1,)), ((), ())),
                preferred_element_type=jnp.float32)
    return kernel


# ---------------------- attention + aggregation kernel ----------------------
def _make_attention_kernel(num_heads, out_feats, negative_slope, apply_elu,
                           mean_heads, out_dim, out_pad, agg_dtype):
    neg = float(negative_slope)  # python scalar -> jaxpr literal, not a const

    def kernel(adj_ref, er_ref, el_ref, elmax_ref, z_ref, b_ref, o_ref):
        # Additive adjacency mask, built once per dst strip (shared by heads).
        mask_bias = jnp.where(adj_ref[...] > 0, 0.0, -1e30)      # (TILE_V, N)

        head_outs = []
        for hd in range(num_heads):
            el_row = el_ref[hd:hd + 1, :]                        # (1, N)
            er_col = er_ref[:, hd:hd + 1]                        # (TILE_V, 1)

            # Analytic row max: LeakyReLU is monotone, so
            #   max_u LeakyReLU(er[v]+el[u]) = LeakyReLU(er[v] + max_u el[u]).
            # (Assumes attention-logit dynamic range << 80 so live entries do
            # not underflow; masked lanes are forced to 0 by the -1e30 bias.)
            e_max = er_col + elmax_ref[hd:hd + 1, :]             # (TILE_V, 1)
            e_max = jnp.maximum(e_max, neg * e_max)

            e = er_col + el_row                                  # broadcast add
            e = jnp.maximum(e, neg * e)                          # LeakyReLU
            e = e + mask_bias                                    # mask non-edges
            p = jnp.exp(e - e_max)                               # (TILE_V, N)

            denom = jnp.maximum(jnp.sum(p, axis=1, keepdims=True), 1e-9)

            # Aggregate, then normalize (folds the NxN divide into an F-wide
            # multiply; kept exact -- approx reciprocal saves nothing on a
            # (TILE_V, 1) vector and would cost accuracy).
            z_h = z_ref[hd]                                      # (N, F) free view
            rst = jnp.dot(p.astype(agg_dtype), z_h.astype(agg_dtype),
                          preferred_element_type=jnp.float32)    # (TILE_V, F)
            rst = rst * (1.0 / denom) + b_ref[hd:hd + 1, :]
            head_outs.append(rst)

        if mean_heads:
            # Per-head matmuls + cheap post-matmul scale; fusing heads into one
            # GEMM would not reduce MXU passes (output stays F lanes wide) but
            # would add H quadratic VPU multiplies, so it is intentionally not
            # done.
            out = head_outs[0]
            for r in head_outs[1:]:
                out = out + r
            out = out * (1.0 / num_heads)
        else:
            out = jnp.concatenate(head_outs, axis=-1)            # (TILE_V, H*F)

        if apply_elu:
            out = jnp.where(out > 0.0, out,
                            jnp.exp(jnp.minimum(out, 0.0)) - 1.0)

        if out_pad > out_dim:
            # Lane-dense writeback for the narrow (num_classes) final layer:
            # pad to 128 lanes so the store is a single unmasked vst.
            pad = jnp.broadcast_to(out[:, :1] * 0.0,
                                   (out.shape[0], out_pad - out_dim))
            out = jnp.concatenate([out, pad], axis=-1)

        o_ref[...] = out

    return kernel


# ------------------------------ layer wrapper -------------------------------
def gat_conv_pallas(h, adj, w, attn_l, attn_r, bias, *, negative_slope,
                    apply_elu, mean_heads, agg_dtype=jnp.float32):
    n, din = h.shape
    nh, f = attn_l.shape
    out_dim = f if mean_heads else nh * f

    h = h.astype(jnp.float32)
    # Head-major weights (H, Din, F) so the projection kernel indexes heads on
    # the leading axis (one-time wrapper-level reshape).
    w_hm = jnp.transpose(w.astype(jnp.float32).reshape(din, nh, f), (1, 0, 2))
    # Adjacency as a compact int8 mask (4x less HBM traffic than fp32).
    adj_mask = (adj > 0).astype(jnp.int8)

    capacity = _vmem_capacity_bytes()
    budget = max(capacity - 8 * 1024 * 1024, 16 * 1024 * 1024)

    # ---- pass 1: projection (z, el, er), tiled over node rows ----
    tile_p = _pick_tile_p(n)
    z, el_t, er_t = pl.pallas_call(
        _make_proj_kernel(nh),
        grid=(n // tile_p,),
        in_specs=[
            pl.BlockSpec((tile_p, din), lambda i: (i, 0)),
            pl.BlockSpec((nh, din, f), lambda i: (0, 0, 0)),   # W resident
            pl.BlockSpec((nh, f), lambda i: (0, 0)),           # attn_l resident
            pl.BlockSpec((nh, f), lambda i: (0, 0)),           # attn_r resident
        ],
        out_specs=[
            pl.BlockSpec((nh, tile_p, f), lambda i: (0, i, 0)),
            pl.BlockSpec((nh, tile_p), lambda i: (0, i)),
            pl.BlockSpec((tile_p, nh), lambda i: (i, 0)),
        ],
        out_shape=(
            jax.ShapeDtypeStruct((nh, n, f), jnp.float32),     # z, head-major
            jax.ShapeDtypeStruct((nh, n), jnp.float32),        # el
            jax.ShapeDtypeStruct((n, nh), jnp.float32),        # er
        ),
        compiler_params=pltpu.CompilerParams(
            dimension_semantics=("parallel",),
            vmem_limit_bytes=budget),
    )(h, w_hm, attn_l.astype(jnp.float32), attn_r.astype(jnp.float32))

    # Per-head max of el, used for the analytic softmax row-max (tiny XLA op).
    el_max = jnp.max(el_t, axis=1, keepdims=True)              # (nh, 1)

    out_pad = 128 if (mean_heads and out_dim < 128) else out_dim

    # ---- pass 2: attention + aggregation, tiled over destination strips ----
    tile_v = _pick_tile_v(n, nh, f, out_pad, budget)
    kernel = _make_attention_kernel(nh, f, negative_slope, apply_elu,
                                    mean_heads, out_dim, out_pad, agg_dtype)
    out = pl.pallas_call(
        kernel,
        grid=(n // tile_v,),
        in_specs=[
            pl.BlockSpec((tile_v, n), lambda i: (i, 0)),       # adj strip (int8)
            pl.BlockSpec((tile_v, nh), lambda i: (i, 0)),      # er strip
            pl.BlockSpec((nh, n), lambda i: (0, 0)),           # el resident
            pl.BlockSpec((nh, 1), lambda i: (0, 0)),           # el_max resident
            pl.BlockSpec((nh, n, f), lambda i: (0, 0, 0)),     # z resident
            pl.BlockSpec((nh, f), lambda i: (0, 0)),           # bias resident
        ],
        out_specs=pl.BlockSpec((tile_v, out_pad), lambda i: (i, 0)),
        out_shape=jax.ShapeDtypeStruct((n, out_pad), jnp.float32),
        compiler_params=pltpu.CompilerParams(
            dimension_semantics=("parallel",),
            vmem_limit_bytes=budget),
    )(adj_mask, er_t, el_t, el_max, z, bias.astype(jnp.float32))

    if out_pad != out_dim:
        out = out[:, :out_dim]
    return out


def gat_forward(adjs, x, params, *, negative_slope=0.2):
    """GAT.forward: hidden layers (ELU + flatten heads), last layer mean(1)."""
    h = x
    for l in range(len(params) - 1):
        w, al, ar, b = params[l]
        h = gat_conv_pallas(h, adjs[l], w, al, ar, b,
                            negative_slope=negative_slope,
                            apply_elu=True, mean_heads=False)
    w, al, ar, b = params[-1]
    return gat_conv_pallas(h, adjs[-1], w, al, ar, b,
                           negative_slope=negative_slope,
                           apply_elu=False, mean_heads=True)


# ---------------- pure-JAX reference (for correctness check) ----------------
def gat_conv_ref(h, adj, w, al, ar, b, *, negative_slope, apply_elu,
                 mean_heads):
    n = h.shape[0]
    nh, f = al.shape
    z = (h @ w).reshape(n, nh, f)
    el = jnp.sum(z * al[None], axis=-1)                    # (N, H) src
    er = jnp.sum(z * ar[None], axis=-1)                    # (N, H) dst
    e = er[:, None, :] + el[None, :, :]                    # (Nd, Ns, H)
    e = jnp.where(e > 0, e, negative_slope * e)
    mask = (adj > 0)[:, :, None]
    e = jnp.where(mask, e, -1e30)
    e_max = jnp.max(e, axis=1, keepdims=True)
    p = jnp.where(mask, jnp.exp(e - e_max), 0.0)
    alpha = p / jnp.maximum(jnp.sum(p, axis=1, keepdims=True), 1e-9)
    rst = jnp.einsum('vuh,uhf->vhf', alpha, z) + b[None]
    if mean_heads:
        out = rst.mean(axis=1)
    else:
        out = rst
    if apply_elu:
        out = jnp.where(out > 0, out, jnp.exp(out) - 1.0)
    if not mean_heads:
        out = out.reshape(n, nh * f)
    return out


def gat_forward_ref(adjs, x, params, *, negative_slope=0.2):
    h = x
    for l in range(len(params) - 1):
        w, al, ar, b = params[l]
        h = gat_conv_ref(h, adjs[l], w, al, ar, b,
                         negative_slope=negative_slope,
                         apply_elu=True, mean_heads=False)
    w, al, ar, b = params[-1]
    return gat_conv_ref(h, adjs[-1], w, al, ar, b,
                        negative_slope=negative_slope,
                        apply_elu=False, mean_heads=True)


if __name__ == "__main__":
    # Small, deterministic configuration (num_layers=2, heads=[2, 2]).
    N = 32
    in_dim = 16
    num_hidden = 8
    num_classes = 4
    heads = [2, 2]
    num_layers = 2
    negative_slope = 0.2

    key = jax.random.PRNGKey(0)
    ks = jax.random.split(key, 8)

    x = jax.random.normal(ks[0], (N, in_dim), jnp.float32)

    # One dense adjacency mask per layer (directed edges + self loops).
    adjs = []
    for l in range(num_layers):
        a = (jax.random.uniform(ks[1 + l], (N, N)) < 0.25).astype(jnp.float32)
        a = jnp.maximum(a, jnp.eye(N, dtype=jnp.float32))
        adjs.append(a)

    def init_layer(k, din, fout, nh):
        kw, kl, kr, kb = jax.random.split(k, 4)
        w = jax.random.normal(kw, (din, nh * fout), jnp.float32) * 0.1
        al = jax.random.normal(kl, (nh, fout), jnp.float32) * 0.1
        ar = jax.random.normal(kr, (nh, fout), jnp.float32) * 0.1
        b = jax.random.normal(kb, (nh, fout), jnp.float32) * 0.01
        return (w, al, ar, b)

    params = [
        init_layer(ks[4], in_dim, num_hidden, heads[0]),
        init_layer(ks[5], num_hidden * heads[0], num_classes, heads[1]),
    ]

    logits = gat_forward(adjs, x, params, negative_slope=negative_slope)
    logits = jax.block_until_ready(logits)

    assert logits.shape == (N, num_classes), logits.shape

    ref = gat_forward_ref(adjs, x, params, negative_slope=negative_slope)
    np.testing.assert_allclose(np.asarray(logits), np.asarray(ref),
                               rtol=1e-4, atol=1e-4)

    print("KERNEL_OK")
</pallas_src>

<mosaic_0001>
module attributes {stable_mosaic.version = 11 : i64} {
  func.func @kernel(%arg0: i32, %arg1: memref<32x16xf32, #tpu.memory_space<vmem>>, %arg2: memref<2x16x8xf32, #tpu.memory_space<vmem>>, %arg3: memref<2x8xf32, #tpu.memory_space<vmem>>, %arg4: memref<2x8xf32, #tpu.memory_space<vmem>>, %arg5: memref<2x32x8xf32, #tpu.memory_space<vmem>>, %arg6: memref<2x32xf32, #tpu.memory_space<vmem>>, %arg7: memref<32x2xf32, #tpu.memory_space<vmem>>) attributes {dimension_semantics = [#tpu.dimension_semantics<parallel>], iteration_bounds = array<i64: 1>, scalar_prefetch = 0 : i64, scratch_operands = 0 : i64, tpu.core_type = #tpu.core_type<tc>, window_params = [{transform_indices = @transform_0, window_bounds = array<i64: 32, 16>}, {pipeline_mode = #tpu.pipeline_mode<synchronous>, transform_indices = @transform_1, window_bounds = array<i64: 2, 16, 8>}, {pipeline_mode = #tpu.pipeline_mode<synchronous>, transform_indices = @transform_2, window_bounds = array<i64: 2, 8>}, {pipeline_mode = #tpu.pipeline_mode<synchronous>, transform_indices = @transform_3, window_bounds = array<i64: 2, 8>}, {transform_indices = @transform_4, window_bounds = array<i64: 2, 32, 8>}, {transform_indices = @transform_5, window_bounds = array<i64: 2, 32>}, {transform_indices = @transform_6, window_bounds = array<i64: 32, 2>}]} {
    %c0 = arith.constant 0 : index
    %c0_0 = arith.constant 0 : index
    %0 = vector.load %arg1[%c0, %c0_0] : memref<32x16xf32, #tpu.memory_space<vmem>>, vector<32x16xf32>
    %c0_1 = arith.constant 0 : index
    %c0_2 = arith.constant 0 : index
    %c0_3 = arith.constant 0 : index
    %1 = vector.load %arg2[%c0_1, %c0_2, %c0_3] : memref<2x16x8xf32, #tpu.memory_space<vmem>>, vector<1x16x8xf32>
    %2 = vector.shape_cast %1 : vector<1x16x8xf32> to vector<16x8xf32>
    %cst = arith.constant dense<0.000000e+00> : vector<32x8xf32>
    %3 = tpu.matmul %0, %2, %cst {dimension_numbers = #tpu.dot_dimension_numbers<[1], [0], [0], [1], [0, 0, 1, 1], [], []>} : vector<32x16xf32>, vector<16x8xf32>, vector<32x8xf32> -> vector<32x8xf32>
    %c0_4 = arith.constant 0 : index
    %c0_5 = arith.constant 0 : index
    %c0_6 = arith.constant 0 : index
    %4 = vector.load %arg5[%c0_4, %c0_5, %c0_6] : memref<2x32x8xf32, #tpu.memory_space<vmem>>, vector<1x32x8xf32>
    %5 = vector.shape_cast %4 : vector<1x32x8xf32> to vector<32x8xf32>
    %6 = vector.shape_cast %3 : vector<32x8xf32> to vector<1x32x8xf32>
    tpu.vector_store %arg5[%c0_4, %c0_5, %c0_6], %6 {strides = array<i32>} : memref<2x32x8xf32, #tpu.memory_space<vmem>>, vector<1x32x8xf32>,
    %c0_7 = arith.constant 0 : index
    %c0_8 = arith.constant 0 : index
    %7 = vector.load %arg3[%c0_7, %c0_8] : memref<2x8xf32, #tpu.memory_space<vmem>>, vector<1x8xf32>
    %cst_9 = arith.constant dense<0.000000e+00> : vector<1x32xf32>
    %8 = tpu.matmul %7, %3, %cst_9 {dimension_numbers = #tpu.dot_dimension_numbers<[1], [1], [0], [0], [0, 0, 1, 0], [], []>} : vector<1x8xf32>, vector<32x8xf32>, vector<1x32xf32> -> vector<1x32xf32>
    %c0_10 = arith.constant 0 : index
    %c0_11 = arith.constant 0 : index
    %9 = vector.load %arg6[%c0_10, %c0_11] : memref<2x32xf32, #tpu.memory_space<vmem>>, vector<1x32xf32>
    tpu.vector_store %arg6[%c0_10, %c0_11], %8 {strides = array<i32>} : memref<2x32xf32, #tpu.memory_space<vmem>>, vector<1x32xf32>,
    %c0_12 = arith.constant 0 : index
    %c0_13 = arith.constant 0 : index
    %10 = vector.load %arg4[%c0_12, %c0_13] : memref<2x8xf32, #tpu.memory_space<vmem>>, vector<1x8xf32>
    %cst_14 = arith.constant dense<0.000000e+00> : vector<32x1xf32>
    %11 = tpu.matmul %3, %10, %cst_14 {dimension_numbers = #tpu.dot_dimension_numbers<[1], [1], [0], [0], [0, 0, 1, 0], [], []>} : vector<32x8xf32>, vector<1x8xf32>, vector<32x1xf32> -> vector<32x1xf32>
    %c0_15 = arith.constant 0 : index
    %c0_16 = arith.constant 0 : index
    %12 = vector.load %arg7[%c0_15, %c0_16] : memref<32x2xf32, #tpu.memory_space<vmem>>, vector<32x1xf32>
    tpu.vector_store %arg7[%c0_15, %c0_16], %11 {strides = array<i32>} : memref<32x2xf32, #tpu.memory_space<vmem>>, vector<32x1xf32>,
    %c1 = arith.constant 1 : index
    %c0_17 = arith.constant 0 : index
    %c0_18 = arith.constant 0 : index
    %13 = vector.load %arg2[%c1, %c0_17, %c0_18] : memref<2x16x8xf32, #tpu.memory_space<vmem>>, vector<1x16x8xf32>
    %14 = vector.shape_cast %13 : vector<1x16x8xf32> to vector<16x8xf32>
    %cst_19 = arith.constant dense<0.000000e+00> : vector<32x8xf32>
    %15 = tpu.matmul %0, %14, %cst_19 {dimension_numbers = #tpu.dot_dimension_numbers<[1], [0], [0], [1], [0, 0, 1, 1], [], []>} : vector<32x16xf32>, vector<16x8xf32>, vector<32x8xf32> -> vector<32x8xf32>
    %c1_20 = arith.constant 1 : index
    %c0_21 = arith.constant 0 : index
    %c0_22 = arith.constant 0 : index
    %16 = vector.load %arg5[%c1_20, %c0_21, %c0_22] : memref<2x32x8xf32, #tpu.memory_space<vmem>>, vector<1x32x8xf32>
    %17 = vector.shape_cast %16 : vector<1x32x8xf32> to vector<32x8xf32>
    %18 = vector.shape_cast %15 : vector<32x8xf32> to vector<1x32x8xf32>
    tpu.vector_store %arg5[%c1_20, %c0_21, %c0_22], %18 {strides = array<i32>} : memref<2x32x8xf32, #tpu.memory_space<vmem>>, vector<1x32x8xf32>,
    %c1_23 = arith.constant 1 : index
    %c0_24 = arith.constant 0 : index
    %19 = vector.load %arg3[%c1_23, %c0_24] : memref<2x8xf32, #tpu.memory_space<vmem>>, vector<1x8xf32>
    %cst_25 = arith.constant dense<0.000000e+00> : vector<1x32xf32>
    %20 = tpu.matmul %19, %15, %cst_25 {dimension_numbers = #tpu.dot_dimension_numbers<[1], [1], [0], [0], [0, 0, 1, 0], [], []>} : vector<1x8xf32>, vector<32x8xf32>, vector<1x32xf32> -> vector<1x32xf32>
    %c1_26 = arith.constant 1 : index
    %c0_27 = arith.constant 0 : index
    %21 = vector.load %arg6[%c1_26, %c0_27] : memref<2x32xf32, #tpu.memory_space<vmem>>, vector<1x32xf32>
    tpu.vector_store %arg6[%c1_26, %c0_27], %20 {strides = array<i32>} : memref<2x32xf32, #tpu.memory_space<vmem>>, vector<1x32xf32>,
    %c1_28 = arith.constant 1 : index
    %c0_29 = arith.constant 0 : index
    %22 = vector.load %arg4[%c1_28, %c0_29] : memref<2x8xf32, #tpu.memory_space<vmem>>, vector<1x8xf32>
    %cst_30 = arith.constant dense<0.000000e+00> : vector<32x1xf32>
    %23 = tpu.matmul %15, %22, %cst_30 {dimension_numbers = #tpu.dot_dimension_numbers<[1], [1], [0], [0], [0, 0, 1, 0], [], []>} : vector<32x8xf32>, vector<1x8xf32>, vector<32x1xf32> -> vector<32x1xf32>
    %c0_31 = arith.constant 0 : index
    %c1_32 = arith.constant 1 : index
    %24 = vector.load %arg7[%c0_31, %c1_32] : memref<32x2xf32, #tpu.memory_space<vmem>>, vector<32x1xf32>
    tpu.vector_store %arg7[%c0_31, %c1_32], %23 {strides = array<i32>} : memref<32x2xf32, #tpu.memory_space<vmem>>, vector<32x1xf32>,
    return
  }
  func.func @transform_0(%arg0: i32) -> (i32, i32) {
    %c0_i32 = arith.constant 0 : i32
    %c0_i32_0 = arith.constant 0 : i32
    return %arg0, %c0_i32 : i32, i32
  }
  func.func @transform_1(%arg0: i32) -> (i32, i32, i32) {
    %c0_i32 = arith.constant 0 : i32
    %c0_i32_0 = arith.constant 0 : i32
    %c0_i32_1 = arith.constant 0 : i32
    %c0_i32_2 = arith.constant 0 : i32
    return %c0_i32, %c0_i32_0, %c0_i32_1 : i32, i32, i32
  }
  func.func @transform_2(%arg0: i32) -> (i32, i32) {
    %c0_i32 = arith.constant 0 : i32
    %c0_i32_0 = arith.constant 0 : i32
    %c0_i32_1 = arith.constant 0 : i32
    return %c0_i32, %c0_i32_0 : i32, i32
  }
  func.func @transform_3(%arg0: i32) -> (i32, i32) {
    %c0_i32 = arith.constant 0 : i32
    %c0_i32_0 = arith.constant 0 : i32
    %c0_i32_1 = arith.constant 0 : i32
    return %c0_i32, %c0_i32_0 : i32, i32
  }
  func.func @transform_4(%arg0: i32) -> (i32, i32, i32) {
    %c0_i32 = arith.constant 0 : i32
    %c0_i32_0 = arith.constant 0 : i32
    %c0_i32_1 = arith.constant 0 : i32
    return %c0_i32, %arg0, %c0_i32_0 : i32, i32, i32
  }
  func.func @transform_5(%arg0: i32) -> (i32, i32) {
    %c0_i32 = arith.constant 0 : i32
    %c0_i32_0 = arith.constant 0 : i32
    return %c0_i32, %arg0 : i32, i32
  }
  func.func @transform_6(%arg0: i32) -> (i32, i32) {
    %c0_i32 = arith.constant 0 : i32
    %c0_i32_0 = arith.constant 0 : i32
    return %arg0, %c0_i32 : i32, i32
  }
}

</mosaic_0001>

<bundles_post_ra>
// kernel: tpu_custom_call.1
= control target key start
LH: loop header
LB: loop body
LE: loop exit
PB: predicated region body
PF: predicated region fallthrough
CT: control target
= control target key end

     0   :  { %vm27_vm0 = vcmask 130048   ;;  %s750_s0 = inlined_call_operand.vmem [shape: f32[32,16], index: 0, kind: input, shape index: {}]   ;;  %s751_s1 = inlined_call_operand.vmem [shape: f32[2,16,8], index: 1, kind: input, shape index: {}]   ;;  %s752_s2 = inlined_call_operand.vmem [shape: f32[2,8], index: 2, kind: input, shape index: {}]   ;;  %s753_s3 = inlined_call_operand.vmem [shape: f32[2,8], index: 3, kind: input, shape index: {}]   ;;  %s754_s4 = inlined_call_operand.vmem [shape: f32[2,32,8], index: 4, kind: output, shape index: {0}]   ;;  %s755_s5 = inlined_call_operand.hbm [shape: f32[2,32], index: 5, kind: output, shape index: {1}]   ;;  %s756_s6 = inlined_call_operand.vmem [shape: f32[32,2], index: 6, kind: output, shape index: {2}]  }
   0x1   :  { %v26_v0 = vld [vmem:[%s751_s1 + $0x8] sm:$0xff]  ;;  %v483_v1 = vld [vmem:[%s751_s1 + $0x18] sm:$0xff]  ;;  %v25_v2 = vld [vmem:[%s751_s1] sm:$0xff] }
   0x2   :  { %520 = vmatprep.subr.mxu1 %v26_v0  ;;  %541 = vmatprep.subr.mxu0 %v483_v1  ;;  %v482_v3 = vld [vmem:[%s751_s1 + $0x10] sm:$0xff]  ;;  %v21_v4 = vld [vmem:[%s750_s0] sm:$0xff] }
   0x3   :  { %521 = vmatpush3.msra.mxu1 %v26_v0  ;;  %542 = vmatpush3.msra.mxu0 %v483_v1 }
   0x4   :  { %12 = vsyncpa [#allocation3], 0  ;;  %522 = vmatprep.subr.mxu1 %v25_v2  ;;  %543 = vmatprep.subr.mxu0 %v482_v3  ;;  %v22_v5 = vld [vmem:[%s750_s0 + $0x8] sm:$0xff]  ;;  %v23_v6 = vld [vmem:[%s750_s0 + $0x10] sm:$0xff]  ;;  %v587_v8 = vmov 0.0   ;;  %vm588_vm1 = vmmov 0  }
   0x5   :  { %523 = vmatpush3.msra.mxu1 %v25_v2  ;;  %524 = vmatprep.mubr.msk.f32.mxu1 %vm27_vm0, %v21_v4  ;;  %v24_v7 = vld [vmem:[%s750_s0 + $0x18] sm:$0xff]  ;;  %vm125_vm2 = vcmask 64512   ;;  %v497_v9 = vld [vmem:[%s753_s3 + $0x1] ss:$0 sm:$0xff]  ;;  %v481_v10 = vld [vmem:[%s753_s3] ss:$0 sm:$0xff] }
   0x6   :  { %544 = vmatpush3.msra.mxu0 %v482_v3  ;;  %545 = vmatprep.mubr.msk.f32.mxu0 %vm27_vm0, %v21_v4  ;;  %v130_v35 = vld [vmem:[%s752_s2] sm:$0x1]  ;;  %v337_v36 = vld [vmem:[%s752_s2 + $0x1] sm:$0x1]  ;;  %vm239_vm3 = vcmask 7168   ;;  %vm445_vm4 = vcmask 15368  }
   0x7   :  { %525 = vmatmul.mubr.msk.f32.vlgmr.msra.gmra.mxu1 %vm27_vm0, %v22_v5  ;;  %546 = vmatmul.mubr.msk.f32.vlgmr.msra.gmra.mxu0 %vm27_vm0, %v22_v5  ;;  %s589_s21 = smov [#allocation2]   ;;  %vm216_vm5 = vcmask 253952  }
   0x8   :  { %527 = vmatprep.mubr.msk.f32.mxu1 %vm27_vm0, %v23_v6  ;;  %548 = vmatprep.mubr.msk.f32.mxu0 %vm27_vm0, %v23_v6  ;;  %s458_s22 = sshll.u32 %s589_s21, 4  ;;  %s459_s22 = int_to_ptr.vmem [resolvable:$true] %s458_s22 }
   0x9   :  { %530 = vmatprep.subr.mxu1 %v587_v8  ;;  %551 = vmatprep.subr.mxu0 %v587_v8  ;;  %s565_s23 = scalar_lea.vmem %s459_s22, 32  ;;  %p570_p1 = scmp.lt.s32.totalorder %s459_s22, %s459_s22 }
   0xa   :  { %p566_p0 = scmp.ne.s32.totalorder %s459_s22, %s565_s23  ;;  %p571_p2 = scmp.lt.s32.totalorder %s565_s23, %s565_s23 }
   0xb   :  { %528 = vmatmul.mubr.msk.f32.gmra.mxu1 %vm27_vm0, %v24_v7  ;;  %549 = vmatmul.mubr.msk.f32.gmra.mxu0 %vm27_vm0, %v24_v7 }
   0xc   :  { %538 = vmatprep.mubr.msk.f32.mxu1 %vm588_vm1, %v587_v8  ;;  %559 = vmatprep.mubr.msk.f32.mxu0 %vm588_vm1, %v587_v8  ;;  %p572_p3 = por %p571_p2, %p570_p1 }
   0xe   :  { %p573_p4 = pnand %p572_p3, %p566_p0 }
  0xc7   :  { %v526_v11 = vpop.f32.mrf.mxu1  ;;  %v547_v12 = vpop.f32.mrf.mxu0 }
  0xc8   :  { %127 = vst.msk [vmem:[%s754_s4 + $0x8] sm:$0xff] %vm125_vm2, %v526_v11  ;;  %489 = vst.msk [vmem:[%s754_s4 + $0x28] sm:$0xff] %vm125_vm2, %v547_v12  ;;  %v430_v13 = vmul.f32 %v547_v12, %v497_v9  ;;  %v224_v14 = vmul.f32 %v526_v11, %v481_v10 }
  0xc9   :  { %v106_v15 = vpop.f32.mrf.mxu1  ;;  %v313_v16 = vpop.f32.mrf.mxu0 }
  0xca   :  { %126 = vst.msk [vmem:[%s754_s4] sm:$0xff] %vm125_vm2, %v106_v15  ;;  %488 = vst.msk [vmem:[%s754_s4 + $0x20] sm:$0xff] %vm125_vm2, %v313_v16  ;;  %v436_v17 = vsel %vm125_vm2, %v430_v13, 0.0  ;;  %v230_v18 = vsel %vm125_vm2, %v224_v14, 0.0  ;;  %v223_v19 = vmul.f32 %v481_v10, %v106_v15  ;;  %v429_v27 = vmul.f32 %v497_v9, %v313_v16 }
  0xcb   :  { %437 = vadd.xlane.f32.xlu1 %v436_v17  ;;  %v550_v20 = vpop.f32.mrf.mxu0  ;;  %231 = vadd.xlane.f32.xlu0 %v230_v18  ;;  %v529_v21 = vpop.f32.mrf.mxu1 }
  0xcc   :  { %491 = vst.msk [vmem:[%s754_s4 + $0x38] sm:$0xff] %vm125_vm2, %v550_v20  ;;  %129 = vst.msk [vmem:[%s754_s4 + $0x18] sm:$0xff] %vm125_vm2, %v529_v21  ;;  %531 = vmatpush3.xpose.msk.msra.mxu1 %vm125_vm2, %v529_v21  ;;  %552 = vmatpush3.xpose.msk.msra.mxu0 %vm125_vm2, %v550_v20  ;;  %v226_v22 = vmul.f32 %v529_v21, %v481_v10  ;;  %v227_v25 = vsel %vm125_vm2, %v223_v19, 0.0  ;;  %v433_v29 = vsel %vm125_vm2, %v429_v27, 0.0 }
  0xcd   :  { %v116_v23 = vpop.f32.mrf.mxu1  ;;  %v323_v24 = vpop.f32.mrf.mxu0  ;;  %553 = vmatprep.subr.mxu0 %v587_v8  ;;  %532 = vmatprep.subr.mxu1 %v587_v8  ;;  %v432_v32 = vmul.f32 %v550_v20, %v497_v9 }
  0xce   :  { %128 = vst.msk [vmem:[%s754_s4 + $0x10] sm:$0xff] %vm125_vm2, %v116_v23  ;;  %490 = vst.msk [vmem:[%s754_s4 + $0x30] sm:$0xff] %vm125_vm2, %v323_v24  ;;  %v236_v26 = vsel %vm125_vm2, %v226_v22, 0.0  ;;  %v225_v28 = vmul.f32 %v481_v10, %v116_v23  ;;  %v431_v31 = vmul.f32 %v497_v9, %v323_v24 }
  0xcf   :  { %228 = vadd.xlane.f32.xlu0 %v227_v25  ;;  %237 = vadd.xlane.f32.xlu1 %v236_v26  ;;  %v442_v34 = vsel %vm125_vm2, %v432_v32, 0.0 }
  0xd0   :  { %533 = vmatpush3.xpose.msk.msra.mxu1 %vm125_vm2, %v116_v23  ;;  %554 = vmatpush3.xpose.msk.msra.mxu0 %vm125_vm2, %v323_v24  ;;  %v233_v30 = vsel %vm125_vm2, %v225_v28, 0.0  ;;  %v439_v33 = vsel %vm125_vm2, %v431_v31, 0.0 }
  0xd1   :  { %555 = vmatprep.subr.mxu0 %v587_v8  ;;  %534 = vmatprep.subr.mxu1 %v587_v8 }
  0xd3   :  { %434 = vadd.xlane.f32.xlu0 %v433_v29  ;;  %234 = vadd.xlane.f32.xlu1 %v233_v30 }
  0xd4   :  { %535 = vmatpush3.xpose.msk.msra.mxu1 %vm125_vm2, %v526_v11  ;;  %556 = vmatpush3.xpose.msk.msra.mxu0 %vm125_vm2, %v547_v12 }
  0xd5   :  { %557 = vmatprep.subr.mxu0 %v587_v8  ;;  %536 = vmatprep.subr.mxu1 %v587_v8 }
  0xd7   :  { %440 = vadd.xlane.f32.xlu0 %v439_v33  ;;  %443 = vadd.xlane.f32.xlu1 %v442_v34 }
  0xd8   :  { %537 = vmatpush3.xpose.msk.msra.mxu1 %vm125_vm2, %v106_v15  ;;  %558 = vmatpush3.xpose.msk.msra.mxu0 %vm125_vm2, %v313_v16 }
  0xdb   :  { %539 = vmatmul.mubr.msk.f32.vlgmr.msra.gmra.mxu1 %vm125_vm2, %v130_v35  ;;  %560 = vmatmul.mubr.msk.f32.vlgmr.msra.gmra.mxu0 %vm125_vm2, %v337_v36 }
 0x154   :  { %v438_v37 = vpop.xlane.xlu1 %437  ;;  %v232_v38 = vpop.xlane.xlu0 %231 }
 0x155   :  { %241 = vst.msk [vmem:[%s756_s6 + $0x8] sm:$0xff] %vm239_vm3, %v232_v38 }
 0x156   :  { %447 = vst.msk [vmem:[%s756_s6 + $0x8] sm:$0xff] %vm445_vm4, %v438_v37 }
 0x158   :  { %v229_v39 = vpop.xlane.xlu0 %228  ;;  %v238_v40 = vpop.xlane.xlu1 %237 }
 0x159   :  { %240 = vst.msk [vmem:[%s756_s6] sm:$0xff] %vm239_vm3, %v229_v39  ;;  %243 = vst.msk [vmem:[%s756_s6 + $0x18] sm:$0xff] %vm239_vm3, %v238_v40 }
 0x15c   :  { %v435_v41 = vpop.xlane.xlu0 %434  ;;  %v235_v42 = vpop.xlane.xlu1 %234 }
 0x15d   :  { %446 = vst.msk [vmem:[%s756_s6] sm:$0xff] %vm445_vm4, %v435_v41 }
 0x15e   :  { %242 = vst.msk [vmem:[%s756_s6 + $0x10] sm:$0xff] %vm239_vm3, %v235_v42 }
 0x160   :  { %v441_v43 = vpop.xlane.xlu0 %440  ;;  %v444_v44 = vpop.xlane.xlu1 %443 }
 0x161   :  { %448 = vst.msk [vmem:[%s756_s6 + $0x10] sm:$0xff] %vm445_vm4, %v441_v43  ;;  %449 = vst.msk [vmem:[%s756_s6 + $0x18] sm:$0xff] %vm445_vm4, %v444_v44 }
 0x19b   :  { %v212_v45 = vpop.f32.mrf.mxu1  ;;  %v419_v46 = vpop.f32.mrf.mxu0 }
 0x19c   :  { %217 = vst.msk [vmem:[#allocation2] sm:$0x1] %vm216_vm5, %v212_v45  ;;  %423 = vst.msk [vmem:[#allocation2 + $0x1] sm:$0x1] %vm216_vm5, %v419_v46 }
 0x19d   :  { %v540_v47 = vpop.f32.mrf.mxu1  ;;  %v561_v48 = vpop.f32.mrf.mxu0 }
 0x19e   :  { %576 = shalt.err (!%p573_p4)
}
 0x19f   :  { %461 = dma.vmem_to_hbm [thread:$0]  %s459_s22, 32, %s755_s5, [#allocation3]  }
 0x1a0   :  { %585 = dma.done.wait [#allocation3], 32  }
 0x1a1   :  { %586 = vsyncadd [#allocation3], 4294967264 }
 0x1a2   :  { %471 = vsyncpa [#allocation3], 1 }

</bundles_post_ra>
